<compile_context>
chip_gen: v5e
topology: v5e:2x2
jax: 0.10.0
libtpu: 0.0.40
codegen_flags: <defaults>
</compile_context>

<pallas_src>
import functools

import jax
import jax.numpy as jnp
from jax import lax
from jax.experimental import pallas as pl
from jax.experimental.pallas import tpu as pltpu


_MASK_VALUE = -1e30  # finite "minus infinity" so online softmax stays NaN-free
_VMEM_LIMIT = 32 * 1024 * 1024


def _pick_row_tile(n):
    for t in (1024, 512, 256, 128):
        if n % t == 0:
            return t
    return n  # small shapes: single full-extent block


def _pick_seq_tile(t_len):
    for t in (512, 256, 128):
        if t_len % t == 0:
            return t
    return t_len  # small shapes: single full-extent block


# ----------------------------------------------------------------------------
# Kernel 1: fused QKV projection   (tr, C) @ (C, 3C) + bias -> (tr, 3C)
# ----------------------------------------------------------------------------
def _qkv_proj_kernel(x_ref, w_ref, b_ref, o_ref):
    acc = jnp.dot(x_ref[...], w_ref[...], preferred_element_type=jnp.float32)
    o_ref[...] = (acc + b_ref[...]).astype(o_ref.dtype)


# ----------------------------------------------------------------------------
# Kernel 2: flash-style attention + fused output projection.
#   grid = (B, n_q_blocks, n_kv_blocks); kv axis innermost ("arbitrary").
# ----------------------------------------------------------------------------
def _flash_attn_kernel(q_ref, k_ref, v_ref, bias_ref, wo_ref, bo_ref, o_ref,
                       m_sc, l_sc, acc_sc, *, mm_dtype):
    ki = pl.program_id(2)
    f32 = jnp.float32
    exact = jnp.dtype(mm_dtype) == jnp.dtype(jnp.float32)

    @pl.when(ki == 0)
    def _():
        m_sc[...] = jnp.full(m_sc.shape, _MASK_VALUE, f32)
        l_sc[...] = jnp.zeros(l_sc.shape, f32)
        acc_sc[...] = jnp.zeros(acc_sc.shape, f32)

    q = q_ref[...]                                   # (H, tq, hd) mm_dtype (pre-scaled)
    k = k_ref[...]                                   # (H, tk, hd) mm_dtype

    # scores[h, i, j] = q[h, i, :] . k[h, j, :]   (K consumed untransposed)
    s = lax.dot_general(q, k, (((2,), (2,)), ((0,), (0,))),
                        preferred_element_type=f32)  # (H, tq, tk)
    s = s + bias_ref[...][None, :, :]                # additive mask bias, f32

    # Online softmax update (all f32).
    m_prev = m_sc[...]                               # (H, tq, 1)
    m_new = jnp.maximum(m_prev, jnp.max(s, axis=-1, keepdims=True))
    alpha = jnp.exp(m_prev - m_new)
    p = jnp.exp(s - m_new)                           # (H, tq, tk)
    l_sc[...] = alpha * l_sc[...] + jnp.sum(p, axis=-1, keepdims=True)
    pv = lax.dot_general(p.astype(mm_dtype), v_ref[...],
                         (((2,), (1,)), ((0,), (0,))),
                         preferred_element_type=f32)  # (H, tq, hd)
    acc_sc[...] = alpha * acc_sc[...] + pv
    m_sc[...] = m_new

    @pl.when(ki == pl.num_programs(2) - 1)
    def _():
        if exact:
            ctx = acc_sc[...] / l_sc[...]            # bit-faithful path
        else:
            ctx = acc_sc[...] * pl.reciprocal(l_sc[...], approx=True)  # EUP slot
        # concat-over-heads @ Wo  ==  sum_h ctx[h] @ Wo[h]
        out_h = lax.dot_general(ctx.astype(mm_dtype), wo_ref[...],
                                (((2,), (1,)), ((0,), (0,))),
                                preferred_element_type=jnp.float32)   # (H, tq, C)
        out = jnp.sum(out_h, axis=0) + bo_ref[...]                    # (tq, C)
        o_ref[...] = out.astype(o_ref.dtype)


# ----------------------------------------------------------------------------
# Wrapper
# ----------------------------------------------------------------------------
def multi_head_attention(x, params, n_heads, mask=None, *, mm_dtype=jnp.bfloat16):
    """x: (B, T, C) f32. params: weights (C_in, C_out), biases (1, C).

    mask: optional (T, T); nonzero = attend, 0 = masked (same as torch module).
    mm_dtype: dtype of MXU matmul operands (bf16 default on all TPU gens).
    """
    B, T, C = x.shape
    H = n_heads
    assert C % H == 0, "Dimension must be divisible by number of heads."
    hd = C // H
    N = B * T
    scale = float(hd) ** -0.5

    # ---- wrapper-side parameter prep (plain XLA, done once) ----------------
    # Fold the softmax scale into the Q projection.
    wqkv = jnp.concatenate(
        [params["wq"] * scale, params["wk"], params["wv"]], axis=1
    ).astype(mm_dtype)                                        # (C, 3C)
    bqkv = jnp.concatenate(
        [params["bq"] * scale, params["bk"], params["bv"]], axis=1
    ).astype(jnp.float32).reshape(1, 3 * C)                   # (1, 3C)
    wo_h = params["wo"].reshape(H, hd, C).astype(mm_dtype)    # per-head row slices
    bo = params["bo"].reshape(1, C).astype(jnp.float32)

    x2 = x.reshape(N, C).astype(mm_dtype)

    # ---- Kernel 1: fused QKV projection ------------------------------------
    tr = _pick_row_tile(N)
    qkv = pl.pallas_call(
        _qkv_proj_kernel,
        out_shape=jax.ShapeDtypeStruct((N, 3 * C), mm_dtype),
        grid=(N // tr,),
        in_specs=[
            pl.BlockSpec((tr, C), lambda i: (i, 0)),
            pl.BlockSpec((C, 3 * C), lambda i: (0, 0)),
            pl.BlockSpec((1, 3 * C), lambda i: (0, 0)),
        ],
        out_specs=pl.BlockSpec((tr, 3 * C), lambda i: (i, 0)),
        compiler_params=pltpu.CompilerParams(
            dimension_semantics=("parallel",),
            vmem_limit_bytes=_VMEM_LIMIT),
    )(x2, wqkv, bqkv)

    # ---- layout plumbing: split heads -> q, k, v as (B, H, T, hd) -----------
    qkv = qkv.reshape(B, T, 3, H, hd).transpose(2, 0, 3, 1, 4)  # (3, B, H, T, hd)
    q, k, v = qkv[0], qkv[1], qkv[2]

    # ---- attention mask as a small (T, T) additive bias ---------------------
    if mask is None:
        bias = jnp.zeros((T, T), jnp.float32)
    else:
        bias = jnp.where(mask == 0, jnp.float32(_MASK_VALUE),
                         jnp.float32(0.0)).astype(jnp.float32)

    # ---- Kernel 2: flash-style attention + output projection ----------------
    tq = _pick_seq_tile(T)
    tk = _pick_seq_tile(T)
    grid = (B, T // tq, T // tk)

    kernel = functools.partial(_flash_attn_kernel, mm_dtype=mm_dtype)

    out = pl.pallas_call(
        kernel,
        out_shape=jax.ShapeDtypeStruct((B, T, C), x.dtype),
        grid=grid,
        in_specs=[
            pl.BlockSpec((None, H, tq, hd), lambda b, qi, ki: (b, 0, qi, 0)),  # q
            pl.BlockSpec((None, H, tk, hd), lambda b, qi, ki: (b, 0, ki, 0)),  # k
            pl.BlockSpec((None, H, tk, hd), lambda b, qi, ki: (b, 0, ki, 0)),  # v
            pl.BlockSpec((tq, tk), lambda b, qi, ki: (qi, ki)),                # bias
            pl.BlockSpec((H, hd, C), lambda b, qi, ki: (0, 0, 0)),             # wo
            pl.BlockSpec((1, C), lambda b, qi, ki: (0, 0)),                    # bo
        ],
        out_specs=pl.BlockSpec((None, tq, C), lambda b, qi, ki: (b, qi, 0)),
        scratch_shapes=[
            pltpu.VMEM((H, tq, 1), jnp.float32),    # running max m
            pltpu.VMEM((H, tq, 1), jnp.float32),    # running denom l
            pltpu.VMEM((H, tq, hd), jnp.float32),   # running numerator acc
        ],
        compiler_params=pltpu.CompilerParams(
            dimension_semantics=("parallel", "parallel", "arbitrary"),
            vmem_limit_bytes=_VMEM_LIMIT),
    )(q, k, v, bias, wo_h, bo)

    return out


# ----------------------------------------------------------------------------
# Pure-JAX (f32) reference mirroring the PyTorch forward exactly.
# ----------------------------------------------------------------------------
def reference_mha(x, params, n_heads, mask=None):
    B, T, C = x.shape
    hd = C // n_heads
    scale = float(hd) ** -0.5

    def proj(w, b):
        return x @ w + b

    q = proj(params["wq"], params["bq"]).reshape(B, T, n_heads, hd).transpose(0, 2, 1, 3)
    k = proj(params["wk"], params["bk"]).reshape(B, T, n_heads, hd).transpose(0, 2, 1, 3)
    v = proj(params["wv"], params["bv"]).reshape(B, T, n_heads, hd).transpose(0, 2, 1, 3)
    scores = jnp.einsum("bhqd,bhkd->bhqk", q, k) * scale
    if mask is not None:
        scores = jnp.where(mask == 0, -jnp.inf, scores)
    attn = jax.nn.softmax(scores, axis=-1)
    out = jnp.einsum("bhqk,bhkd->bhqd", attn, v)
    out = out.transpose(0, 2, 1, 3).reshape(B, T, C)
    return out @ params["wo"] + params["bo"]


if __name__ == "__main__":
    # Config: dim=32, n_heads=4 -> head_dim=8. Small shapes: B=2, T=8.
    B, T, C, n_heads = 2, 8, 32, 4

    key = jax.random.PRNGKey(0)
    ks = jax.random.split(key, 9)
    scale_w = 1.0 / jnp.sqrt(jnp.float32(C))

    params = {
        "wq": jax.random.normal(ks[0], (C, C), jnp.float32) * scale_w,
        "wk": jax.random.normal(ks[1], (C, C), jnp.float32) * scale_w,
        "wv": jax.random.normal(ks[2], (C, C), jnp.float32) * scale_w,
        "wo": jax.random.normal(ks[3], (C, C), jnp.float32) * scale_w,
        "bq": jax.random.normal(ks[4], (1, C), jnp.float32) * 0.01,
        "bk": jax.random.normal(ks[5], (1, C), jnp.float32) * 0.01,
        "bv": jax.random.normal(ks[6], (1, C), jnp.float32) * 0.01,
        "bo": jax.random.normal(ks[7], (1, C), jnp.float32) * 0.01,
    }

    x = jax.random.normal(ks[8], (B, T, C), jnp.float32)

    # Causal mask (nonzero = attend), exercising the masked_fill path too.
    causal = jnp.tril(jnp.ones((T, T), jnp.float32))

    ref = reference_mha(x, params, n_heads, mask=causal)

    # 1) f32 matmul path: must closely match the f32 reference.
    out_f32 = multi_head_attention(x, params, n_heads, mask=causal,
                                   mm_dtype=jnp.float32)
    jax.block_until_ready(out_f32)
    assert out_f32.shape == (B, T, C)
    assert jnp.allclose(out_f32, ref, atol=1e-3, rtol=1e-3), "f32 mismatch vs reference"

    # 2) Default bf16-operand path (MXU perf mode on all TPU gens): looser tol.
    out_bf16 = multi_head_attention(x, params, n_heads, mask=causal)
    jax.block_until_ready(out_bf16)
    assert jnp.allclose(out_bf16, ref, atol=5e-2, rtol=5e-2), "bf16 mismatch vs reference"

    # 3) mask=None path.
    ref_nomask = reference_mha(x, params, n_heads, mask=None)
    out_nomask = multi_head_attention(x, params, n_heads, mask=None,
                                      mm_dtype=jnp.float32)
    jax.block_until_ready(out_nomask)
    assert jnp.allclose(out_nomask, ref_nomask, atol=1e-3, rtol=1e-3), "no-mask mismatch"

    print("KERNEL_OK")
</pallas_src>

<mosaic_0001>
module attributes {stable_mosaic.version = 11 : i64} {
  func.func @_qkv_proj_kernel(%arg0: i32, %arg1: memref<16x32xf32, #tpu.memory_space<vmem>>, %arg2: memref<32x96xf32, #tpu.memory_space<vmem>>, %arg3: memref<1x96xf32, #tpu.memory_space<vmem>>, %arg4: memref<16x96xf32, #tpu.memory_space<vmem>>) attributes {dimension_semantics = [#tpu.dimension_semantics<parallel>], iteration_bounds = array<i64: 1>, scalar_prefetch = 0 : i64, scratch_operands = 0 : i64, tpu.core_type = #tpu.core_type<tc>, window_params = [{transform_indices = @transform_0, window_bounds = array<i64: 16, 32>}, {pipeline_mode = #tpu.pipeline_mode<synchronous>, transform_indices = @transform_1, window_bounds = array<i64: 32, 96>}, {pipeline_mode = #tpu.pipeline_mode<synchronous>, transform_indices = @transform_2, window_bounds = array<i64: 1, 96>}, {transform_indices = @transform_3, window_bounds = array<i64: 16, 96>}]} {
    %c0 = arith.constant 0 : index
    %c0_0 = arith.constant 0 : index
    %0 = vector.load %arg1[%c0, %c0_0] : memref<16x32xf32, #tpu.memory_space<vmem>>, vector<16x32xf32>
    %c0_1 = arith.constant 0 : index
    %c0_2 = arith.constant 0 : index
    %1 = vector.load %arg2[%c0_1, %c0_2] : memref<32x96xf32, #tpu.memory_space<vmem>>, vector<32x96xf32>
    %cst = arith.constant dense<0.000000e+00> : vector<16x96xf32>
    %2 = tpu.matmul %0, %1, %cst {dimension_numbers = #tpu.dot_dimension_numbers<[1], [0], [0], [1], [0, 0, 1, 1], [], []>} : vector<16x32xf32>, vector<32x96xf32>, vector<16x96xf32> -> vector<16x96xf32>
    %c0_3 = arith.constant 0 : index
    %c0_4 = arith.constant 0 : index
    %3 = vector.load %arg3[%c0_3, %c0_4] : memref<1x96xf32, #tpu.memory_space<vmem>>, vector<1x96xf32>
    %4 = vector.broadcast %3 : vector<1x96xf32> to vector<16x96xf32>
    %5 = arith.addf %2, %4 : vector<16x96xf32>
    %c0_5 = arith.constant 0 : index
    %c0_6 = arith.constant 0 : index
    %6 = vector.load %arg4[%c0_5, %c0_6] : memref<16x96xf32, #tpu.memory_space<vmem>>, vector<16x96xf32>
    tpu.vector_store %arg4[%c0_5, %c0_6], %5 {strides = array<i32>} : memref<16x96xf32, #tpu.memory_space<vmem>>, vector<16x96xf32>,
    return
  }
  func.func @transform_0(%arg0: i32) -> (i32, i32) {
    %c0_i32 = arith.constant 0 : i32
    %c0_i32_0 = arith.constant 0 : i32
    return %arg0, %c0_i32 : i32, i32
  }
  func.func @transform_1(%arg0: i32) -> (i32, i32) {
    %c0_i32 = arith.constant 0 : i32
    %c0_i32_0 = arith.constant 0 : i32
    %c0_i32_1 = arith.constant 0 : i32
    return %c0_i32, %c0_i32_0 : i32, i32
  }
  func.func @transform_2(%arg0: i32) -> (i32, i32) {
    %c0_i32 = arith.constant 0 : i32
    %c0_i32_0 = arith.constant 0 : i32
    %c0_i32_1 = arith.constant 0 : i32
    return %c0_i32, %c0_i32_0 : i32, i32
  }
  func.func @transform_3(%arg0: i32) -> (i32, i32) {
    %c0_i32 = arith.constant 0 : i32
    %c0_i32_0 = arith.constant 0 : i32
    return %arg0, %c0_i32 : i32, i32
  }
}

</mosaic_0001>

<bundles_post_ra>
// kernel: tpu_custom_call.1
= control target key start
LH: loop header
LB: loop body
LE: loop exit
PB: predicated region body
PF: predicated region fallthrough
CT: control target
= control target key end

     0   :  { %8 = vsyncpa [#allocation3], 0  ;;  %s246_s0 = inlined_call_operand.hbm [shape: f32[16,32], index: 0, kind: input, shape index: {}]   ;;  %s247_s1 = inlined_call_operand.hbm [shape: f32[32,96], index: 1, kind: input, shape index: {}]   ;;  %s248_s2 = inlined_call_operand.vmem [shape: f32[1,96], index: 2, kind: input, shape index: {}]   ;;  %s249_s3 = inlined_call_operand.hbm [shape: f32[16,96], index: 3, kind: output, shape index: {}]  }
   0x1   :  { %9 = vsyncpa [#allocation6], 0 }
   0x2   :  { %10 = vsyncpa [#allocation4], 0  ;;  %s15_s14 = sshll.u32 %s246_s0, 4  ;;  %s200_s15 = smov [#allocation2]   ;;  %s16_s14 = int_to_ptr.hbm [resolvable:$true] %s15_s14 }
   0x3   :  { %s17_s16 = sshll.u32 %s200_s15, 4  ;;  %s28_s19 = sshll.u32 %s247_s1, 4  ;;  %s18_s16 = int_to_ptr.vmem [resolvable:$true] %s17_s16  ;;  %s29_s19 = int_to_ptr.hbm [resolvable:$true] %s28_s19 }
   0x4   :  { %s201_s20 = smov 128   ;;  %s202_s21 = smov 8  }
   0x5   :  { %23 = dma.hbm_to_vmem [thread:$0]  %s16_s14, 256, %s18_s16, [#allocation3], %s201_s20, %s201_s20, %s202_s21  }
   0x6   :  { %s203_s22 = smov [#allocation5]  }
   0x7   :  { %s30_s23 = sshll.u32 %s203_s22, 4  ;;  %s31_s23 = int_to_ptr.vmem [resolvable:$true] %s30_s23 }
   0x8   :  { %36 = dma.hbm_to_vmem [thread:$0]  %s29_s19, 512, %s31_s23, [#allocation6], %s201_s20, %s201_s20, %s202_s21  }
   0x9   :  { %194 = dma.done.wait [#allocation3], 256  }
   0xa   :  { %195 = vsyncadd [#allocation3], 4294967040 }
   0xb   :  { %196 = dma.done.wait [#allocation6], 512  }
   0xc   :  { %197 = vsyncadd [#allocation6], 4294966784  ;;  %v52_v0 = vld [vmem:[#allocation5 + $0x18] sm:$0xff]  ;;  %v51_v1 = vld [vmem:[#allocation5 + $0x10] sm:$0xff]  ;;  %vm57_vm0 = vcmask 261120   ;;  %s204_s24 = smov [#allocation7]  }
   0xd   :  { %76 = vmatpush.msra.mxu0 %v52_v0  ;;  %112 = vmatpush.msra.mxu1 %v52_v0  ;;  %v50_v2 = vld [vmem:[#allocation5 + $0x8] sm:$0xff]  ;;  %v49_v3 = vld [vmem:[#allocation5] sm:$0xff]  ;;  %v47_v4 = vld [vmem:[#allocation2] sm:$0xff]  ;;  %s94_s25 = sshll.u32 %s204_s24, 4  ;;  %s96_s28 = sshll.u32 %s249_s3, 4  ;;  %vm87_vm1 = vcmask 785408   ;;  %s95_s25 = int_to_ptr.vmem [resolvable:$true] %s94_s25  ;;  %s97_s28 = int_to_ptr.hbm [resolvable:$true] %s96_s28 }
   0xe   :  { %v48_v5 = vld [vmem:[#allocation2 + $0x8] sm:$0xff]  ;;  %v121_v6 = vld [vmem:[%s248_s2] ss:$0 sm:$0xff] }
   0xf   :  { %77 = vmatpush.msra.mxu0 %v51_v1  ;;  %113 = vmatpush.msra.mxu1 %v51_v1 }
  0x11   :  { %78 = vmatpush.msra.mxu0 %v50_v2  ;;  %114 = vmatpush.msra.mxu1 %v50_v2 }
  0x13   :  { %79 = vmatpush.msra.mxu0 %v49_v3  ;;  %115 = vmatpush.msra.mxu1 %v49_v3 }
  0x14   :  { %110 = vmatmul.msk.f32.vlgmr.msra.gmra.mxu0 %vm57_vm0, %v47_v4  ;;  %111 = vmatmul.msk.f32.vlgmr.msra.gmra.mxu1 %vm57_vm0, %v48_v5 }
  0x91   :  { %v81_v7 = vpop.f32.mrf.mxu0  ;;  %v84_v8 = vpop.f32.mrf.mxu1 }
  0x92   :  { %v82_v9 = vadd.f32 %v121_v6, %v81_v7  ;;  %v85_v10 = vadd.f32 %v121_v6, %v84_v8 }
  0x94   :  { %88 = vst.msk [vmem:[#allocation7] sm:$0xff] %vm87_vm1, %v82_v9 }
  0x95   :  { %89 = vst.msk [vmem:[#allocation7 + $0x8] sm:$0xff] %vm87_vm1, %v85_v10 }
  0x96   :  { %102 = dma.vmem_to_hbm [thread:$0]  %s95_s25, 256, %s97_s28, [#allocation4], %s201_s20, %s201_s20, %s202_s21  }
  0x97   :  { %198 = dma.done.wait [#allocation4], 256  }
  0x98   :  { %199 = vsyncadd [#allocation4], 4294967040 }
  0x99   :  { %107 = vsyncpa [#allocation3], 1 }
  0x9a   :  { %108 = vsyncpa [#allocation6], 1 }
  0x9b   :  { %109 = vsyncpa [#allocation4], 1 }

</bundles_post_ra>
